<compile_context>
chip_gen: v5e
topology: v5e:2x2
jax: 0.10.0
libtpu: 0.0.40
codegen_flags: <defaults>
</compile_context>

<pallas_src>
import functools

import jax
import jax.numpy as jnp
from jax.experimental import pallas as pl
from jax.experimental.pallas import tpu as pltpu

LANE = 128  # vreg lane width / padded hidden size


def _round_up(n, m):
    return ((n + m - 1) // m) * m


def _cdiv(a, b):
    return -(-a // b)


def _device_kind():
    try:
        return jax.devices()[0].device_kind.lower()
    except Exception:
        return ""


def _net_kernel(x_ref, w1_ref, b1_ref, w2_ref, b2_ref, w3_ref, b3_ref,
                wo_ref, bo_ref, o_ref, *, bf16_acts):
    x = x_ref[...]                          # (TB, D) f32
    t = x[:, 0:1]                           # (TB, 1) f32

    act_dt = jnp.bfloat16 if bf16_acts else jnp.float32

    def mxu(v):
        # MXU LHS operand in bf16 (weights are stored bf16); no-op if already bf16.
        return v.astype(jnp.bfloat16)

    # ---- layer 1 on the MXU (K = D is tiny; avoids per-column cross-lane
    #      broadcasts on the VPU/XLU).
    a1 = jnp.dot(mxu(x), w1_ref[...],
                 preferred_element_type=jnp.float32) + b1_ref[...]
    h1 = jnp.tanh(a1.astype(act_dt))

    # ---- layer 2: bf16 MXU matmul, f32 accumulate, tanh in act dtype.
    a2 = jnp.dot(mxu(h1), w2_ref[...],
                 preferred_element_type=jnp.float32) + b2_ref[...]
    h2 = jnp.tanh(a2.astype(act_dt))

    # ---- layer 3 + residual (residual add in f32 for accuracy).
    a3 = jnp.dot(mxu(h2), w3_ref[...],
                 preferred_element_type=jnp.float32) + b3_ref[...]
    r = jnp.tanh(a3.astype(act_dt))
    h3 = h2.astype(jnp.float32) + r.astype(jnp.float32)

    # ---- output layer (K = H, N = 1) and scale by t, all f32 accumulation.
    out = jnp.dot(mxu(h3), wo_ref[...],
                  preferred_element_type=jnp.float32) + bo_ref[...]
    o_ref[...] = (t * out).astype(o_ref.dtype)


@functools.partial(jax.jit, static_argnames=("tb_max", "min_tiles", "bf16_acts"))
def _net_forward_impl(x, params, *, tb_max, min_tiles, bf16_acts):
    B, D = x.shape
    HP = params["w2"].shape[0]              # padded hidden width (128)

    # Batch tile: ~even divisor of the padded batch, sublane (8) aligned.
    B8 = _round_up(B, 8)
    n_tiles = max(_cdiv(B8, tb_max), min_tiles)
    n_tiles = min(n_tiles, max(B8 // 8, 1))     # each tile at least 8 rows
    TB = _round_up(_cdiv(B8, n_tiles), 8)
    padded_B = TB * _cdiv(B8, TB)
    if padded_B != B:
        x = jnp.pad(x, ((0, padded_B - B), (0, 0)))
    grid = (padded_B // TB,)

    const2 = lambda i: (0, 0)               # weights/biases resident in VMEM

    flops = 2 * padded_B * (D * HP + 2 * HP * HP + HP)
    transcendentals = 3 * padded_B * HP
    bytes_accessed = (padded_B * (D + 1) * 4            # x in, y out
                      + (D * HP + 2 * HP * HP + HP) * 2  # bf16 weights
                      + 3 * HP * 4 + 4)                  # f32 biases

    compiler_kwargs = dict(dimension_semantics=("parallel",))
    if TB >= 8192:
        # Only needed for very large tiles (v5e 16 MiB scoped-VMEM default).
        compiler_kwargs["vmem_limit_bytes"] = 64 * 1024 * 1024

    kernel = functools.partial(_net_kernel, bf16_acts=bf16_acts)

    y = pl.pallas_call(
        kernel,
        out_shape=jax.ShapeDtypeStruct((padded_B, 1), jnp.float32),
        grid=grid,
        in_specs=[
            pl.BlockSpec((TB, D), lambda i: (i, 0)),   # x: tiled over batch
            pl.BlockSpec((D, HP), const2),             # w1 (bf16)
            pl.BlockSpec((1, HP), const2),             # b1 (f32)
            pl.BlockSpec((HP, HP), const2),            # w2 (bf16)
            pl.BlockSpec((1, HP), const2),             # b2
            pl.BlockSpec((HP, HP), const2),             # w3 (bf16)
            pl.BlockSpec((1, HP), const2),             # b3
            pl.BlockSpec((HP, 1), const2),             # wo (bf16)
            pl.BlockSpec((1, 1), const2),              # bo
        ],
        out_specs=pl.BlockSpec((TB, 1), lambda i: (i, 0)),
        compiler_params=pltpu.CompilerParams(**compiler_kwargs),
        cost_estimate=pl.CostEstimate(
            flops=flops,
            transcendentals=transcendentals,
            bytes_accessed=bytes_accessed),
    )(
        x,
        params["w1"], params["b1"],
        params["w2"], params["b2"],
        params["w3"], params["b3"],
        params["wo"], params["bo"],
    )
    return y[:B]


def net_forward(x, params, *, tb_max=4096):
    """x: (B, spatial_dim+1) f32. params: *padded* params (see pad_params)."""
    kind = _device_kind()
    # v5e has no bf16 VPU/EUP -> keep f32 activations there.
    bf16_acts = "v5" not in kind
    # On v7x keep the grid >= 2 so the 'parallel' axis splits across both TCs.
    min_tiles = 2 if "v7" in kind else 1
    return _net_forward_impl(x, params, tb_max=tb_max,
                             min_tiles=min_tiles, bf16_acts=bf16_acts)


def init_params(key, spatial_dim, hidden_size=100, output_size=1):
    """PyTorch nn.Linear-style uniform init; weights stored [in, out], f32."""
    in_dim = spatial_dim + 1
    ks = jax.random.split(key, 8)

    def linear(kw, kb, fan_in, fan_out):
        bound = 1.0 / jnp.sqrt(fan_in)
        w = jax.random.uniform(kw, (fan_in, fan_out), jnp.float32, -bound, bound)
        b = jax.random.uniform(kb, (1, fan_out), jnp.float32, -bound, bound)
        return w, b

    w1, b1 = linear(ks[0], ks[1], in_dim, hidden_size)
    w2, b2 = linear(ks[2], ks[3], hidden_size, hidden_size)
    w3, b3 = linear(ks[4], ks[5], hidden_size, hidden_size)
    wo, bo = linear(ks[6], ks[7], hidden_size, output_size)
    return dict(w1=w1, b1=b1, w2=w2, b2=b2, w3=w3, b3=b3, wo=wo, bo=bo)


def pad_params(p, lane=LANE):
    """Zero-pad hidden 100 -> 128; store all matmul weights in bf16.
    Padded rows/cols/bias entries are exactly zero, so tanh(0)=0 keeps the
    padded lanes inert through the residual connection and output layer."""
    H = p["w2"].shape[0]
    HP = _round_up(H, lane)
    pad_h = HP - H
    pad_cols = lambda a: jnp.pad(a, ((0, 0), (0, pad_h)))
    bf16 = jnp.bfloat16
    return dict(
        w1=jnp.pad(p["w1"], ((0, 0), (0, pad_h))).astype(bf16),
        b1=pad_cols(p["b1"]),
        w2=jnp.pad(p["w2"], ((0, pad_h), (0, pad_h))).astype(bf16),
        b2=pad_cols(p["b2"]),
        w3=jnp.pad(p["w3"], ((0, pad_h), (0, pad_h))).astype(bf16),
        b3=pad_cols(p["b3"]),
        wo=jnp.pad(p["wo"], ((0, pad_h), (0, 0))).astype(bf16),
        bo=p["bo"],
    )


def net_ref(x, p):
    """Pure-JAX f32 reference of the PyTorch forward (unpadded params)."""
    t = x[:, 0:1]
    h = jnp.tanh(x @ p["w1"] + p["b1"])
    h = jnp.tanh(h @ p["w2"] + p["b2"])
    h = h + jnp.tanh(h @ p["w3"] + p["b3"])
    out = h @ p["wo"] + p["bo"]
    return t * out


if __name__ == "__main__":
    spatial_dim = 3          # input feature dim = spatial_dim + 1 = 4
    hidden_size = 100        # hard-coded to 100 in the PyTorch __init__
    B = 8

    key = jax.random.PRNGKey(0)
    k_x, k_p = jax.random.split(key)
    x = jax.random.normal(k_x, (B, spatial_dim + 1), jnp.float32)
    params = init_params(k_p, spatial_dim, hidden_size)
    padded = pad_params(params)

    # Single / few-tile path.
    y = jax.block_until_ready(net_forward(x, padded))
    y_ref = net_ref(x, params)
    assert y.shape == (B, 1), y.shape
    # bf16 weights (and bf16 tanh on v6e/v7x) with f32 accumulation.
    assert jnp.allclose(y, y_ref, atol=2e-2, rtol=2e-2), "mismatch vs reference"

    # Multi-tile path (grid > 1, batch not tile-aligned) with a small tile.
    B2 = 40
    x2 = jax.random.normal(jax.random.PRNGKey(1), (B2, spatial_dim + 1), jnp.float32)
    y2 = jax.block_until_ready(net_forward(x2, padded, tb_max=16))
    y2_ref = net_ref(x2, params)
    assert y2.shape == (B2, 1), y2.shape
    assert jnp.allclose(y2, y2_ref, atol=2e-2, rtol=2e-2), "mismatch vs reference (tiled)"

    print("KERNEL_OK")
</pallas_src>

<mosaic_0001>
module attributes {stable_mosaic.version = 11 : i64} {
  func.func @_net_kernel(%arg0: i32, %arg1: memref<8x4xf32, #tpu.memory_space<vmem>>, %arg2: memref<4x128xbf16, #tpu.memory_space<vmem>>, %arg3: memref<1x128xf32, #tpu.memory_space<vmem>>, %arg4: memref<128x128xbf16, #tpu.memory_space<vmem>>, %arg5: memref<1x128xf32, #tpu.memory_space<vmem>>, %arg6: memref<128x128xbf16, #tpu.memory_space<vmem>>, %arg7: memref<1x128xf32, #tpu.memory_space<vmem>>, %arg8: memref<128x1xbf16, #tpu.memory_space<vmem>>, %arg9: memref<1x1xf32, #tpu.memory_space<vmem>>, %arg10: memref<8x1xf32, #tpu.memory_space<vmem>>) attributes {dimension_semantics = [#tpu.dimension_semantics<parallel>], iteration_bounds = array<i64: 1>, scalar_prefetch = 0 : i64, scratch_operands = 0 : i64, tpu.core_type = #tpu.core_type<tc>, window_params = [{transform_indices = @transform_0, window_bounds = array<i64: 8, 4>}, {pipeline_mode = #tpu.pipeline_mode<synchronous>, transform_indices = @transform_1, window_bounds = array<i64: 4, 128>}, {pipeline_mode = #tpu.pipeline_mode<synchronous>, transform_indices = @transform_2, window_bounds = array<i64: 1, 128>}, {pipeline_mode = #tpu.pipeline_mode<synchronous>, transform_indices = @transform_3, window_bounds = array<i64: 128, 128>}, {pipeline_mode = #tpu.pipeline_mode<synchronous>, transform_indices = @transform_4, window_bounds = array<i64: 1, 128>}, {pipeline_mode = #tpu.pipeline_mode<synchronous>, transform_indices = @transform_5, window_bounds = array<i64: 128, 128>}, {pipeline_mode = #tpu.pipeline_mode<synchronous>, transform_indices = @transform_6, window_bounds = array<i64: 1, 128>}, {pipeline_mode = #tpu.pipeline_mode<synchronous>, transform_indices = @transform_7, window_bounds = array<i64: 128, 1>}, {pipeline_mode = #tpu.pipeline_mode<synchronous>, transform_indices = @transform_8, window_bounds = array<i64: 1, 1>}, {transform_indices = @transform_9, window_bounds = array<i64: 8, 1>}]} {
    %c0 = arith.constant 0 : index
    %c0_0 = arith.constant 0 : index
    %0 = vector.load %arg1[%c0, %c0_0] : memref<8x4xf32, #tpu.memory_space<vmem>>, vector<8x4xf32>
    %1 = vector.extract_strided_slice %0 {offsets = [0, 0], sizes = [8, 1], strides = [1, 1]} : vector<8x4xf32> to vector<8x1xf32>
    %2 = arith.truncf %0 : vector<8x4xf32> to vector<8x4xbf16>
    %c0_1 = arith.constant 0 : index
    %c0_2 = arith.constant 0 : index
    %3 = vector.load %arg2[%c0_1, %c0_2] : memref<4x128xbf16, #tpu.memory_space<vmem>>, vector<4x128xbf16>
    %cst = arith.constant dense<0.000000e+00> : vector<8x128xf32>
    %4 = tpu.matmul %2, %3, %cst {dimension_numbers = #tpu.dot_dimension_numbers<[1], [0], [0], [1], [0, 0, 1, 1], [], []>} : vector<8x4xbf16>, vector<4x128xbf16>, vector<8x128xf32> -> vector<8x128xf32>
    %c0_3 = arith.constant 0 : index
    %c0_4 = arith.constant 0 : index
    %5 = vector.load %arg3[%c0_3, %c0_4] : memref<1x128xf32, #tpu.memory_space<vmem>>, vector<1x128xf32>
    %6 = vector.broadcast %5 : vector<1x128xf32> to vector<8x128xf32>
    %7 = arith.addf %4, %6 : vector<8x128xf32>
    %8 = arith.truncf %7 : vector<8x128xf32> to vector<8x128xbf16>
    %9 = math.tanh %8 : vector<8x128xbf16>
    %c0_5 = arith.constant 0 : index
    %c0_6 = arith.constant 0 : index
    %10 = vector.load %arg4[%c0_5, %c0_6] : memref<128x128xbf16, #tpu.memory_space<vmem>>, vector<128x128xbf16>
    %cst_7 = arith.constant dense<0.000000e+00> : vector<8x128xf32>
    %11 = tpu.matmul %9, %10, %cst_7 {dimension_numbers = #tpu.dot_dimension_numbers<[1], [0], [0], [1], [0, 0, 1, 1], [], []>} : vector<8x128xbf16>, vector<128x128xbf16>, vector<8x128xf32> -> vector<8x128xf32>
    %c0_8 = arith.constant 0 : index
    %c0_9 = arith.constant 0 : index
    %12 = vector.load %arg5[%c0_8, %c0_9] : memref<1x128xf32, #tpu.memory_space<vmem>>, vector<1x128xf32>
    %13 = vector.broadcast %12 : vector<1x128xf32> to vector<8x128xf32>
    %14 = arith.addf %11, %13 : vector<8x128xf32>
    %15 = arith.truncf %14 : vector<8x128xf32> to vector<8x128xbf16>
    %16 = math.tanh %15 : vector<8x128xbf16>
    %c0_10 = arith.constant 0 : index
    %c0_11 = arith.constant 0 : index
    %17 = vector.load %arg6[%c0_10, %c0_11] : memref<128x128xbf16, #tpu.memory_space<vmem>>, vector<128x128xbf16>
    %cst_12 = arith.constant dense<0.000000e+00> : vector<8x128xf32>
    %18 = tpu.matmul %16, %17, %cst_12 {dimension_numbers = #tpu.dot_dimension_numbers<[1], [0], [0], [1], [0, 0, 1, 1], [], []>} : vector<8x128xbf16>, vector<128x128xbf16>, vector<8x128xf32> -> vector<8x128xf32>
    %c0_13 = arith.constant 0 : index
    %c0_14 = arith.constant 0 : index
    %19 = vector.load %arg7[%c0_13, %c0_14] : memref<1x128xf32, #tpu.memory_space<vmem>>, vector<1x128xf32>
    %20 = vector.broadcast %19 : vector<1x128xf32> to vector<8x128xf32>
    %21 = arith.addf %18, %20 : vector<8x128xf32>
    %22 = arith.truncf %21 : vector<8x128xf32> to vector<8x128xbf16>
    %23 = math.tanh %22 : vector<8x128xbf16>
    %24 = arith.extf %16 : vector<8x128xbf16> to vector<8x128xf32>
    %25 = arith.extf %23 : vector<8x128xbf16> to vector<8x128xf32>
    %26 = arith.addf %24, %25 : vector<8x128xf32>
    %27 = arith.truncf %26 : vector<8x128xf32> to vector<8x128xbf16>
    %c0_15 = arith.constant 0 : index
    %c0_16 = arith.constant 0 : index
    %28 = vector.load %arg8[%c0_15, %c0_16] : memref<128x1xbf16, #tpu.memory_space<vmem>>, vector<128x1xbf16>
    %cst_17 = arith.constant dense<0.000000e+00> : vector<8x1xf32>
    %29 = tpu.matmul %27, %28, %cst_17 {dimension_numbers = #tpu.dot_dimension_numbers<[1], [0], [0], [1], [0, 0, 1, 1], [], []>} : vector<8x128xbf16>, vector<128x1xbf16>, vector<8x1xf32> -> vector<8x1xf32>
    %c0_18 = arith.constant 0 : index
    %c0_19 = arith.constant 0 : index
    %30 = vector.load %arg9[%c0_18, %c0_19] : memref<1x1xf32, #tpu.memory_space<vmem>>, vector<1x1xf32>
    %31 = vector.broadcast %30 : vector<1x1xf32> to vector<8x1xf32>
    %32 = arith.addf %29, %31 : vector<8x1xf32>
    %33 = arith.mulf %1, %32 : vector<8x1xf32>
    %c0_20 = arith.constant 0 : index
    %c0_21 = arith.constant 0 : index
    %34 = vector.load %arg10[%c0_20, %c0_21] : memref<8x1xf32, #tpu.memory_space<vmem>>, vector<8x1xf32>
    tpu.vector_store %arg10[%c0_20, %c0_21], %33 {strides = array<i32>} : memref<8x1xf32, #tpu.memory_space<vmem>>, vector<8x1xf32>,
    return
  }
  func.func @transform_0(%arg0: i32) -> (i32, i32) {
    %c0_i32 = arith.constant 0 : i32
    %c0_i32_0 = arith.constant 0 : i32
    return %arg0, %c0_i32 : i32, i32
  }
  func.func @transform_1(%arg0: i32) -> (i32, i32) {
    %c0_i32 = arith.constant 0 : i32
    %c0_i32_0 = arith.constant 0 : i32
    %c0_i32_1 = arith.constant 0 : i32
    return %c0_i32, %c0_i32_0 : i32, i32
  }
  func.func @transform_2(%arg0: i32) -> (i32, i32) {
    %c0_i32 = arith.constant 0 : i32
    %c0_i32_0 = arith.constant 0 : i32
    %c0_i32_1 = arith.constant 0 : i32
    return %c0_i32, %c0_i32_0 : i32, i32
  }
  func.func @transform_3(%arg0: i32) -> (i32, i32) {
    %c0_i32 = arith.constant 0 : i32
    %c0_i32_0 = arith.constant 0 : i32
    %c0_i32_1 = arith.constant 0 : i32
    return %c0_i32, %c0_i32_0 : i32, i32
  }
  func.func @transform_4(%arg0: i32) -> (i32, i32) {
    %c0_i32 = arith.constant 0 : i32
    %c0_i32_0 = arith.constant 0 : i32
    %c0_i32_1 = arith.constant 0 : i32
    return %c0_i32, %c0_i32_0 : i32, i32
  }
  func.func @transform_5(%arg0: i32) -> (i32, i32) {
    %c0_i32 = arith.constant 0 : i32
    %c0_i32_0 = arith.constant 0 : i32
    %c0_i32_1 = arith.constant 0 : i32
    return %c0_i32, %c0_i32_0 : i32, i32
  }
  func.func @transform_6(%arg0: i32) -> (i32, i32) {
    %c0_i32 = arith.constant 0 : i32
    %c0_i32_0 = arith.constant 0 : i32
    %c0_i32_1 = arith.constant 0 : i32
    return %c0_i32, %c0_i32_0 : i32, i32
  }
  func.func @transform_7(%arg0: i32) -> (i32, i32) {
    %c0_i32 = arith.constant 0 : i32
    %c0_i32_0 = arith.constant 0 : i32
    %c0_i32_1 = arith.constant 0 : i32
    return %c0_i32, %c0_i32_0 : i32, i32
  }
  func.func @transform_8(%arg0: i32) -> (i32, i32) {
    %c0_i32 = arith.constant 0 : i32
    %c0_i32_0 = arith.constant 0 : i32
    %c0_i32_1 = arith.constant 0 : i32
    return %c0_i32, %c0_i32_0 : i32, i32
  }
  func.func @transform_9(%arg0: i32) -> (i32, i32) {
    %c0_i32 = arith.constant 0 : i32
    %c0_i32_0 = arith.constant 0 : i32
    return %arg0, %c0_i32 : i32, i32
  }
}

</mosaic_0001>

<bundles_post_ra>
// kernel: _net_forward_impl.1
= control target key start
LH: loop header
LB: loop body
LE: loop exit
PB: predicated region body
PF: predicated region fallthrough
CT: control target
= control target key end

     0   :  { %s636_s0 = inlined_call_operand.vmem [shape: f32[8,4], index: 0, kind: input, shape index: {}]   ;;  %s637_s1 = inlined_call_operand.vmem [shape: bf16[4,128], index: 1, kind: input, shape index: {}]   ;;  %s638_s2 = inlined_call_operand.vmem [shape: f32[1,128], index: 2, kind: input, shape index: {}]   ;;  %s639_s3 = inlined_call_operand.vmem [shape: bf16[128,128], index: 3, kind: input, shape index: {}]   ;;  %s640_s4 = inlined_call_operand.vmem [shape: f32[1,128], index: 4, kind: input, shape index: {}]   ;;  %s641_s5 = inlined_call_operand.hbm [shape: bf16[128,128], index: 5, kind: input, shape index: {}]   ;;  %s642_s6 = inlined_call_operand.vmem [shape: f32[1,128], index: 6, kind: input, shape index: {}]   ;;  %s643_s7 = inlined_call_operand.vmem [shape: bf16[128,1], index: 7, kind: input, shape index: {}]   ;;  %s644_s8 = inlined_call_operand.<no memory space> [shape: f32[1,1], index: 8, kind: input, shape index: {}]   ;;  %s645_s9 = inlined_call_operand.vmem [shape: f32[8,1], index: 9, kind: output, shape index: {}]  }
   0x1   :  { %v14_v0 = vstv %s644_s8 }
   0x2   :  { %15 = vst [vmem:[#allocation2] sm:$0x1] %v14_v0 }
   0x3   :  { %16 = vsyncpa [#allocation4], 0  ;;  %s31_s13 = sshll.u32 %s641_s5, 4  ;;  %s506_s14 = smov [#allocation3]   ;;  %s32_s13 = int_to_ptr.hbm [resolvable:$true] %s31_s13 }
   0x4   :  { %s33_s15 = sshll.u32 %s506_s14, 4  ;;  %s507_s16 = smov 64   ;;  %s34_s15 = int_to_ptr.vmem [resolvable:$true] %s33_s15 }
   0x5   :  { %s508_s17 = smov 4  }
   0x6   :  { %39 = dma.hbm_to_vmem [thread:$0]  %s32_s13, 1024, %s34_s15, [#allocation4], %s507_s16, %s507_s16, %s508_s17  }
   0x7   :  { %504 = dma.done.wait [#allocation4], 1024  }
   0x8   :  { %505 = vsyncadd [#allocation4], 4294966272  ;;  %vm62_vm0 = vcmask 1041408   ;;  %v53_v1 = vld [vmem:[%s637_s1] sm:$0x3]  ;;  %v450_v3 = vld [vmem:[%s639_s3 + $0x38] sm:$0xff] }
   0x9   :  { %v571_v2 = vld [vmem:[%s636_s0] sm:$0xff]  ;;  %v64_v4 = vsel %vm62_vm0, %v53_v1, 0  ;;  %vm58_vm1 = vcmask 31744   ;;  %151 = vmatpush.bf16.msra.mxu1 %v450_v3  ;;  %v449_v6 = vld [vmem:[%s639_s3 + $0x30] sm:$0xff]  ;;  %v448_v7 = vld [vmem:[%s639_s3 + $0x28] sm:$0xff]  ;;  %vm339_vm2 = vcmask 7168  }
   0xa   :  { %v52_v5 = vpack.c.bf16 %v571_v2, %v571_v2  ;;  %73 = vmatpush.bf16.msra.mxu0 %v64_v4  ;;  %v447_v8 = vld [vmem:[%s639_s3 + $0x20] sm:$0xff]  ;;  %v446_v9 = vld [vmem:[%s639_s3 + $0x18] sm:$0xff]  ;;  %v445_v10 = vld [vmem:[%s639_s3 + $0x10] sm:$0xff] }
   0xb   :  { %v444_v11 = vld [vmem:[%s639_s3 + $0x8] sm:$0xff]  ;;  %v443_v12 = vld [vmem:[%s639_s3] sm:$0xff]  ;;  %v457_v14 = vld [vmem:[#allocation3 + $0x30] sm:$0xff] }
   0xc   :  { %v458_v13 = vld [vmem:[#allocation3 + $0x38] sm:$0xff]  ;;  %v456_v15 = vld [vmem:[#allocation3 + $0x28] sm:$0xff]  ;;  %v455_v16 = vld [vmem:[#allocation3 + $0x20] sm:$0xff] }
   0xd   :  { %346 = vmatmul.msk.bf16.vlgmr.msra.gmra.mxu0 %vm58_vm1, %v52_v5  ;;  %152 = vmatpush.bf16.msra.mxu1 %v449_v6  ;;  %v470_v17 = vld [vmem:[%s638_s2] ss:$0 sm:$0xff]  ;;  %v453_v26 = vld [vmem:[#allocation3 + $0x10] sm:$0xff]  ;;  %v452_v27 = vld [vmem:[#allocation3 + $0x8] sm:$0xff] }
   0xe   :  { %236 = vmatpush.bf16.msra.mxu2 %v458_v13  ;;  %v454_v25 = vld [vmem:[#allocation3 + $0x18] sm:$0xff]  ;;  %v451_v28 = vld [vmem:[#allocation3] sm:$0xff]  ;;  %v465_v30 = vld [vmem:[%s643_s7 + $0x30] sm:$0xff] }
   0xf   :  { %v466_v29 = vld [vmem:[%s643_s7 + $0x38] sm:$0xff]  ;;  %v464_v31 = vld [vmem:[%s643_s7 + $0x28] sm:$0xff]  ;;  %v471_v32 = vld [vmem:[%s640_s4] ss:$0 sm:$0xff] }
  0x10   :  { %325 = vmatpush.bf16.msra.mxu3 %v466_v29  ;;  %v463_v40 = vld [vmem:[%s643_s7 + $0x20] sm:$0xff]  ;;  %v462_v41 = vld [vmem:[%s643_s7 + $0x18] sm:$0xff]  ;;  %v461_v42 = vld [vmem:[%s643_s7 + $0x10] sm:$0xff] }
  0x11   :  { %153 = vmatpush.bf16.msra.mxu1 %v448_v7  ;;  %v460_v43 = vld [vmem:[%s643_s7 + $0x8] sm:$0xff]  ;;  %v459_v44 = vld [vmem:[%s643_s7] sm:$0xff] }
  0x12   :  { %237 = vmatpush.bf16.msra.mxu2 %v457_v14  ;;  %v472_v45 = vld [vmem:[%s642_s6] ss:$0 sm:$0xff] }
  0x13   :  { %v473_v57 = vld [vmem:[#allocation2] ss:$0 sm:$0xff] }
  0x14   :  { %326 = vmatpush.bf16.msra.mxu3 %v465_v30 }
  0x15   :  { %154 = vmatpush.bf16.msra.mxu1 %v447_v8 }
  0x16   :  { %238 = vmatpush.bf16.msra.mxu2 %v456_v15 }
  0x18   :  { %327 = vmatpush.bf16.msra.mxu3 %v464_v31 }
  0x19   :  { %155 = vmatpush.bf16.msra.mxu1 %v446_v9 }
  0x1a   :  { %239 = vmatpush.bf16.msra.mxu2 %v455_v16 }
  0x1c   :  { %328 = vmatpush.bf16.msra.mxu3 %v463_v40 }
  0x1d   :  { %156 = vmatpush.bf16.msra.mxu1 %v445_v10 }
  0x1e   :  { %240 = vmatpush.bf16.msra.mxu2 %v454_v25 }
  0x20   :  { %329 = vmatpush.bf16.msra.mxu3 %v462_v41 }
  0x21   :  { %157 = vmatpush.bf16.msra.mxu1 %v444_v11 }
  0x22   :  { %241 = vmatpush.bf16.msra.mxu2 %v453_v26 }
  0x24   :  { %330 = vmatpush.bf16.msra.mxu3 %v461_v42 }
  0x25   :  { %158 = vmatpush.bf16.msra.mxu1 %v443_v12 }
  0x26   :  { %242 = vmatpush.bf16.msra.mxu2 %v452_v27 }
  0x28   :  { %331 = vmatpush.bf16.msra.mxu3 %v460_v43 }
  0x2a   :  { %243 = vmatpush.bf16.msra.mxu2 %v451_v28 }
  0x2c   :  { %332 = vmatpush.bf16.msra.mxu3 %v459_v44 }
  0x8a   :  { %v75_v18 = vpop.f32.mrf.mxu0 }
  0x8b   :  { %v76_v19 = vadd.f32 %v470_v17, %v75_v18 }
  0x8d   :  { %v79_v20 = vpack.c.bf16 %v76_v19, %v76_v19 }
  0x8f   :  { %v80_v21 = vunpack.c.l.bf16 %v79_v20 }
  0x91   :  { %474 = vtanh.f32 %v80_v21 }
  0x92   :  { %v77_v22 = vpop.f32.mrf.mxu0 }
  0x97   :  { %v475_v23 = vpop.eup %474 }
  0x98   :  { %v82_v24 = vpack.c.bf16 %v475_v23, %v475_v23 }
  0x9a   :  { %159 = vmatmul.bf16.vlgmr.msra.gmra.mxu1 %v82_v24 }
 0x117   :  { %v160_v33 = vpop.f32.mrf.mxu1 }
 0x118   :  { %v161_v34 = vadd.f32 %v471_v32, %v160_v33 }
 0x11a   :  { %v164_v35 = vpack.c.bf16 %v161_v34, %v161_v34 }
 0x11c   :  { %v165_v36 = vunpack.c.l.bf16 %v164_v35 }
 0x11e   :  { %476 = vtanh.f32 %v165_v36 }
 0x11f   :  { %v162_v37 = vpop.f32.mrf.mxu1 }
 0x124   :  { %v477_v38 = vpop.eup %476 }
 0x125   :  { %v167_v39 = vpack.c.bf16 %v477_v38, %v477_v38 }
 0x127   :  { %244 = vmatmul.bf16.vlgmr.msra.gmra.mxu2 %v167_v39  ;;  %v253_v53 = vunpack.c.l.bf16 %v167_v39 }
 0x1aa   :  { %v245_v46 = vpop.f32.mrf.mxu2 }
 0x1ab   :  { %v246_v47 = vadd.f32 %v472_v45, %v245_v46 }
 0x1ad   :  { %v249_v48 = vpack.c.bf16 %v246_v47, %v246_v47 }
 0x1af   :  { %v250_v49 = vunpack.c.l.bf16 %v249_v48 }
 0x1b1   :  { %478 = vtanh.f32 %v250_v49 }
 0x1b2   :  { %v247_v50 = vpop.f32.mrf.mxu2 }
 0x1b7   :  { %v479_v51 = vpop.eup %478 }
 0x1b8   :  { %v252_v52 = vpack.c.bf16 %v479_v51, %v479_v51 }
 0x1ba   :  { %v254_v54 = vunpack.c.l.bf16 %v252_v52 }
 0x1bc   :  { %v255_v55 = vadd.f32 %v254_v54, %v253_v53 }
 0x1be   :  { %v256_v56 = vpack.c.bf16 %v255_v55, %v255_v55 }
 0x1c0   :  { %333 = vmatmul.bf16.vlgmr.msra.gmra.mxu3 %v256_v56 }
 0x243   :  { %v334_v58 = vpop.f32.mrf.mxu3 }
 0x244   :  { %v335_v59 = vadd.f32 %v473_v57, %v334_v58 }
 0x246   :  { %v338_v60 = vmul.f32 %v335_v59, %v571_v2 }
 0x248   :  { %340 = vst.msk [vmem:[%s645_s9] sm:$0xff] %vm339_vm2, %v338_v60 }
 0x24b   :  { %v336_v61 = vpop.f32.mrf.mxu3 }
 0x24c   :  { %345 = vsyncpa [#allocation4], 1 }

</bundles_post_ra>
